<compile_context>
chip_gen: v6e
topology: v6e:2x2x1
jax: 0.10.0
libtpu: 0.0.40
codegen_flags: <defaults>
</compile_context>

<pallas_src>
import functools

import jax
import jax.numpy as jnp
from jax.experimental import pallas as pl
from jax.experimental.pallas import tpu as pltpu

LANE = 128          # lane width: fc head is zero-padded to this many columns
MAX_TB = 2048       # max batch tile; per-step VMEM stays ~10 MiB at TB=2048


def _round_up(x, m):
    return ((x + m - 1) // m) * m


def _default_epilogue_dtype():
    """bf16 epilogue on chips with native bf16 VPU (v6e/v7x); f32 on v5e."""
    try:
        kind = jax.devices()[0].device_kind.lower()
    except Exception:
        return jnp.bfloat16
    if "v5 lite" in kind or "v5e" in kind or "v5litepod" in kind:
        return jnp.float32
    return jnp.bfloat16


def mlp_cbna_kernel(x_ref, w1_ref, t1_ref, w2_ref, t2_ref, w3_ref, b3_ref,
                    o_ref, *, epi_dtype):
    # Linear1 (BN scale pre-folded into w1) + shift + ReLU.  Dropout == identity
    # in eval mode.  x is cast to bf16 in-kernel (single f32 HBM read of x).
    h = jnp.dot(x_ref[...].astype(jnp.bfloat16), w1_ref[...],
                preferred_element_type=jnp.float32)
    h = jnp.maximum(h.astype(epi_dtype) + t1_ref[...].astype(epi_dtype), 0.0)
    # Linear2 (BN scale pre-folded into w2) + shift + ReLU.
    h = jnp.dot(h.astype(jnp.bfloat16), w2_ref[...],
                preferred_element_type=jnp.float32)
    h = jnp.maximum(h.astype(epi_dtype) + t2_ref[...].astype(epi_dtype), 0.0)
    # fc head: lane-dense 128-wide padded output, stored in bf16.
    out = jnp.dot(h.astype(jnp.bfloat16), w3_ref[...],
                  preferred_element_type=jnp.float32)
    o_ref[...] = (out + b3_ref[...]).astype(o_ref.dtype)


def mlp_cbna(x, params, out_dim, *, max_tb=MAX_TB, epi_dtype=None):
    """Eval-mode forward.  x: (B, n_meta_features) f32.  Returns (B, out_dim) f32."""
    if epi_dtype is None:
        epi_dtype = _default_epilogue_dtype()

    B, K = x.shape
    D1 = params["w1"].shape[1]
    D2 = params["w2"].shape[1]
    Np = params["w3"].shape[1]            # lane-padded output width (128)

    # Batch tile: multiple of 8 (16 where possible for bf16 sublane packing),
    # capped at MAX_TB, and sized so large batches give >= 2 grid steps (v7x
    # megacore).  No wrapper-side padding: grid = cdiv(B, TB); the final
    # partial block's out-of-bounds rows compute garbage that is masked on
    # store (and never pollutes valid rows, since the reduction is over K).
    TB = max(8, min(max_tb, _round_up(pl.cdiv(B, 2), 16), _round_up(B, 8)))
    grid = (pl.cdiv(B, TB),)

    in_specs = [
        pl.BlockSpec((TB, K), lambda i: (i, 0)),        # x tile, pipelined
        pl.BlockSpec((K, D1), lambda i: (0, 0)),        # w1*s1 (VMEM-resident)
        pl.BlockSpec((1, D1), lambda i: (0, 0)),        # t1 (shift)
        pl.BlockSpec((D1, D2), lambda i: (0, 0)),       # w2*s2
        pl.BlockSpec((1, D2), lambda i: (0, 0)),        # t2 (shift)
        pl.BlockSpec((D2, Np), lambda i: (0, 0)),       # w3 (lane-padded)
        pl.BlockSpec((1, Np), lambda i: (0, 0)),        # b3 (lane-padded)
    ]
    out_specs = pl.BlockSpec((TB, Np), lambda i: (i, 0))  # lane-dense, bf16

    flops = 2 * B * (K * D1 + D1 * D2 + D2 * Np)
    bytes_accessed = (
        x.size * 4                                                  # x (f32)
        + (params["w1"].size + params["w2"].size + params["w3"].size) * 2
        + (params["t1"].size + params["t2"].size + params["b3"].size) * 4
        + B * Np * 2)                                               # out (bf16)

    out_padded = pl.pallas_call(
        functools.partial(mlp_cbna_kernel, epi_dtype=epi_dtype),
        out_shape=jax.ShapeDtypeStruct((B, Np), jnp.bfloat16),
        grid=grid,
        in_specs=in_specs,
        out_specs=out_specs,
        compiler_params=pltpu.CompilerParams(
            dimension_semantics=("parallel",),    # split batch across v7x TCs
            vmem_limit_bytes=24 * 1024 * 1024),   # modest; ~10 MiB actually used
        cost_estimate=pl.CostEstimate(
            flops=flops, bytes_accessed=bytes_accessed, transcendentals=0),
    )(x, params["w1"], params["t1"], params["w2"], params["t2"],
      params["w3"], params["b3"])

    # Slice the true columns; tiny (B, out_dim) cast back to f32.
    return out_padded[:, :out_dim].astype(jnp.float32)


def init_params(key, n_meta_features, n_meta_dim, out_dim, eps=1e-5):
    """Deterministic parameter init matching the module's shapes.

    Linear weights/biases: U(-1/sqrt(fan_in), 1/sqrt(fan_in)) (PyTorch default).
    BatchNorm1d: gamma=1, beta=0, running_mean=0, running_var=1 (fresh init).
    The BN scale (gamma/sqrt(var+eps)) is folded into the preceding Linear
    weight in f32 *before* the bf16 cast; the shift (beta + (bias-mean)*scale)
    stays as a small f32 vector applied in the kernel epilogue.
    NOTE: real trained running stats / gamma / beta must be folded identically.
    The fc head is zero-padded from out_dim to LANE columns (lane-dense store).
    """
    ks = jax.random.split(key, 6)

    def linear(kw, kb, fan_in, fan_out):
        bound = 1.0 / (fan_in ** 0.5)
        w = jax.random.uniform(kw, (fan_in, fan_out), jnp.float32, -bound, bound)
        b = jax.random.uniform(kb, (fan_out,), jnp.float32, -bound, bound)
        return w, b

    w1, b1 = linear(ks[0], ks[1], n_meta_features, n_meta_dim[0])
    w2, b2 = linear(ks[2], ks[3], n_meta_dim[0], n_meta_dim[1])
    w3, b3 = linear(ks[4], ks[5], n_meta_dim[1], out_dim)

    def fold_bn(w, b, dim):
        gamma = jnp.ones((dim,), jnp.float32)
        beta = jnp.zeros((dim,), jnp.float32)
        rmean = jnp.zeros((dim,), jnp.float32)
        rvar = jnp.ones((dim,), jnp.float32)
        scale = gamma / jnp.sqrt(rvar + eps)
        w_folded = w * scale[None, :]                 # fold scale into weight (f32)
        shift = beta + (b - rmean) * scale
        return w_folded, shift.reshape(1, dim)

    w1f, t1 = fold_bn(w1, b1, n_meta_dim[0])
    w2f, t2 = fold_bn(w2, b2, n_meta_dim[1])

    # Lane-dense fc head: pad output columns to LANE with zeros.
    n_pad = _round_up(out_dim, LANE)
    w3_p = jnp.zeros((n_meta_dim[1], n_pad), jnp.float32).at[:, :out_dim].set(w3)
    b3_p = jnp.zeros((1, n_pad), jnp.float32).at[:, :out_dim].set(b3)

    return dict(
        w1=w1f.astype(jnp.bfloat16), t1=t1,
        w2=w2f.astype(jnp.bfloat16), t2=t2,
        w3=w3_p.astype(jnp.bfloat16), b3=b3_p)


def mlp_cbna_ref(x, p, out_dim, epi_dtype=jnp.float32):
    """Pure-JAX reference of the eval-mode forward with the same numerics."""
    h = jnp.dot(x.astype(jnp.bfloat16), p["w1"],
                preferred_element_type=jnp.float32)
    h = jnp.maximum(h.astype(epi_dtype) + p["t1"].astype(epi_dtype), 0.0)
    h = jnp.dot(h.astype(jnp.bfloat16), p["w2"],
                preferred_element_type=jnp.float32)
    h = jnp.maximum(h.astype(epi_dtype) + p["t2"].astype(epi_dtype), 0.0)
    out = jnp.dot(h.astype(jnp.bfloat16), p["w3"],
                  preferred_element_type=jnp.float32) + p["b3"]
    return out.astype(jnp.bfloat16)[:, :out_dim].astype(jnp.float32)


if __name__ == "__main__":
    B = 8                 # small demo batch; kernel tiles larger B too
    n_meta_features = 16  # args.n_meta_features
    n_meta_dim = [512, 128]
    out_dim = 8

    key = jax.random.PRNGKey(0)
    kx, kp = jax.random.split(key)
    x = jax.random.normal(kx, (B, n_meta_features), jnp.float32)
    params = init_params(kp, n_meta_features, n_meta_dim, out_dim)

    epi = _default_epilogue_dtype()
    out = jax.block_until_ready(mlp_cbna(x, params, out_dim, epi_dtype=epi))
    ref = mlp_cbna_ref(x, params, out_dim, epi_dtype=epi)
    assert out.shape == (B, out_dim)
    assert jnp.allclose(out, ref, atol=3e-2, rtol=3e-2), (
        float(jnp.max(jnp.abs(out - ref))))
    print("KERNEL_OK")
</pallas_src>

<mosaic_0001>
module attributes {stable_mosaic.version = 11 : i64} {
  func.func @mlp_cbna_kernel(%arg0: i32, %arg1: memref<8x16xf32, #tpu.memory_space<vmem>>, %arg2: memref<16x512xbf16, #tpu.memory_space<vmem>>, %arg3: memref<1x512xf32, #tpu.memory_space<vmem>>, %arg4: memref<512x128xbf16, #tpu.memory_space<vmem>>, %arg5: memref<1x128xf32, #tpu.memory_space<vmem>>, %arg6: memref<128x128xbf16, #tpu.memory_space<vmem>>, %arg7: memref<1x128xf32, #tpu.memory_space<vmem>>, %arg8: memref<8x128xbf16, #tpu.memory_space<vmem>>) attributes {dimension_semantics = [#tpu.dimension_semantics<parallel>], iteration_bounds = array<i64: 1>, scalar_prefetch = 0 : i64, scratch_operands = 0 : i64, tpu.core_type = #tpu.core_type<tc>, window_params = [{transform_indices = @transform_0, window_bounds = array<i64: 8, 16>}, {pipeline_mode = #tpu.pipeline_mode<synchronous>, transform_indices = @transform_1, window_bounds = array<i64: 16, 512>}, {pipeline_mode = #tpu.pipeline_mode<synchronous>, transform_indices = @transform_2, window_bounds = array<i64: 1, 512>}, {pipeline_mode = #tpu.pipeline_mode<synchronous>, transform_indices = @transform_3, window_bounds = array<i64: 512, 128>}, {pipeline_mode = #tpu.pipeline_mode<synchronous>, transform_indices = @transform_4, window_bounds = array<i64: 1, 128>}, {pipeline_mode = #tpu.pipeline_mode<synchronous>, transform_indices = @transform_5, window_bounds = array<i64: 128, 128>}, {pipeline_mode = #tpu.pipeline_mode<synchronous>, transform_indices = @transform_6, window_bounds = array<i64: 1, 128>}, {transform_indices = @transform_7, window_bounds = array<i64: 8, 128>}]} {
    %c0 = arith.constant 0 : index
    %c0_0 = arith.constant 0 : index
    %0 = vector.load %arg1[%c0, %c0_0] : memref<8x16xf32, #tpu.memory_space<vmem>>, vector<8x16xf32>
    %1 = arith.truncf %0 : vector<8x16xf32> to vector<8x16xbf16>
    %c0_1 = arith.constant 0 : index
    %c0_2 = arith.constant 0 : index
    %2 = vector.load %arg2[%c0_1, %c0_2] : memref<16x512xbf16, #tpu.memory_space<vmem>>, vector<16x512xbf16>
    %cst = arith.constant dense<0.000000e+00> : vector<8x512xf32>
    %3 = tpu.matmul %1, %2, %cst {dimension_numbers = #tpu.dot_dimension_numbers<[1], [0], [0], [1], [0, 0, 1, 1], [], []>} : vector<8x16xbf16>, vector<16x512xbf16>, vector<8x512xf32> -> vector<8x512xf32>
    %4 = arith.truncf %3 : vector<8x512xf32> to vector<8x512xbf16>
    %c0_3 = arith.constant 0 : index
    %c0_4 = arith.constant 0 : index
    %5 = vector.load %arg3[%c0_3, %c0_4] : memref<1x512xf32, #tpu.memory_space<vmem>>, vector<1x512xf32>
    %6 = arith.truncf %5 : vector<1x512xf32> to vector<1x512xbf16>
    %7 = vector.broadcast %6 : vector<1x512xbf16> to vector<8x512xbf16>
    %8 = arith.addf %4, %7 : vector<8x512xbf16>
    %cst_5 = arith.constant 0.000000e+00 : bf16
    %9 = vector.broadcast %cst_5 : bf16 to vector<8x512xbf16>
    %10 = arith.maximumf %8, %9 : vector<8x512xbf16>
    %c0_6 = arith.constant 0 : index
    %c0_7 = arith.constant 0 : index
    %11 = vector.load %arg4[%c0_6, %c0_7] : memref<512x128xbf16, #tpu.memory_space<vmem>>, vector<512x128xbf16>
    %cst_8 = arith.constant dense<0.000000e+00> : vector<8x128xf32>
    %12 = tpu.matmul %10, %11, %cst_8 {dimension_numbers = #tpu.dot_dimension_numbers<[1], [0], [0], [1], [0, 0, 1, 1], [], []>} : vector<8x512xbf16>, vector<512x128xbf16>, vector<8x128xf32> -> vector<8x128xf32>
    %13 = arith.truncf %12 : vector<8x128xf32> to vector<8x128xbf16>
    %c0_9 = arith.constant 0 : index
    %c0_10 = arith.constant 0 : index
    %14 = vector.load %arg5[%c0_9, %c0_10] : memref<1x128xf32, #tpu.memory_space<vmem>>, vector<1x128xf32>
    %15 = arith.truncf %14 : vector<1x128xf32> to vector<1x128xbf16>
    %16 = vector.broadcast %15 : vector<1x128xbf16> to vector<8x128xbf16>
    %17 = arith.addf %13, %16 : vector<8x128xbf16>
    %cst_11 = arith.constant 0.000000e+00 : bf16
    %18 = vector.broadcast %cst_11 : bf16 to vector<8x128xbf16>
    %19 = arith.maximumf %17, %18 : vector<8x128xbf16>
    %c0_12 = arith.constant 0 : index
    %c0_13 = arith.constant 0 : index
    %20 = vector.load %arg6[%c0_12, %c0_13] : memref<128x128xbf16, #tpu.memory_space<vmem>>, vector<128x128xbf16>
    %cst_14 = arith.constant dense<0.000000e+00> : vector<8x128xf32>
    %21 = tpu.matmul %19, %20, %cst_14 {dimension_numbers = #tpu.dot_dimension_numbers<[1], [0], [0], [1], [0, 0, 1, 1], [], []>} : vector<8x128xbf16>, vector<128x128xbf16>, vector<8x128xf32> -> vector<8x128xf32>
    %c0_15 = arith.constant 0 : index
    %c0_16 = arith.constant 0 : index
    %22 = vector.load %arg7[%c0_15, %c0_16] : memref<1x128xf32, #tpu.memory_space<vmem>>, vector<1x128xf32>
    %23 = vector.broadcast %22 : vector<1x128xf32> to vector<8x128xf32>
    %24 = arith.addf %21, %23 : vector<8x128xf32>
    %25 = arith.truncf %24 : vector<8x128xf32> to vector<8x128xbf16>
    %c0_17 = arith.constant 0 : index
    %c0_18 = arith.constant 0 : index
    %26 = vector.load %arg8[%c0_17, %c0_18] : memref<8x128xbf16, #tpu.memory_space<vmem>>, vector<8x128xbf16>
    tpu.vector_store %arg8[%c0_17, %c0_18], %25 {strides = array<i32>} : memref<8x128xbf16, #tpu.memory_space<vmem>>, vector<8x128xbf16>,
    return
  }
  func.func @transform_0(%arg0: i32) -> (i32, i32) {
    %c0_i32 = arith.constant 0 : i32
    %c0_i32_0 = arith.constant 0 : i32
    return %arg0, %c0_i32 : i32, i32
  }
  func.func @transform_1(%arg0: i32) -> (i32, i32) {
    %c0_i32 = arith.constant 0 : i32
    %c0_i32_0 = arith.constant 0 : i32
    %c0_i32_1 = arith.constant 0 : i32
    return %c0_i32, %c0_i32_0 : i32, i32
  }
  func.func @transform_2(%arg0: i32) -> (i32, i32) {
    %c0_i32 = arith.constant 0 : i32
    %c0_i32_0 = arith.constant 0 : i32
    %c0_i32_1 = arith.constant 0 : i32
    return %c0_i32, %c0_i32_0 : i32, i32
  }
  func.func @transform_3(%arg0: i32) -> (i32, i32) {
    %c0_i32 = arith.constant 0 : i32
    %c0_i32_0 = arith.constant 0 : i32
    %c0_i32_1 = arith.constant 0 : i32
    return %c0_i32, %c0_i32_0 : i32, i32
  }
  func.func @transform_4(%arg0: i32) -> (i32, i32) {
    %c0_i32 = arith.constant 0 : i32
    %c0_i32_0 = arith.constant 0 : i32
    %c0_i32_1 = arith.constant 0 : i32
    return %c0_i32, %c0_i32_0 : i32, i32
  }
  func.func @transform_5(%arg0: i32) -> (i32, i32) {
    %c0_i32 = arith.constant 0 : i32
    %c0_i32_0 = arith.constant 0 : i32
    %c0_i32_1 = arith.constant 0 : i32
    return %c0_i32, %c0_i32_0 : i32, i32
  }
  func.func @transform_6(%arg0: i32) -> (i32, i32) {
    %c0_i32 = arith.constant 0 : i32
    %c0_i32_0 = arith.constant 0 : i32
    %c0_i32_1 = arith.constant 0 : i32
    return %c0_i32, %c0_i32_0 : i32, i32
  }
  func.func @transform_7(%arg0: i32) -> (i32, i32) {
    %c0_i32 = arith.constant 0 : i32
    %c0_i32_0 = arith.constant 0 : i32
    return %arg0, %c0_i32 : i32, i32
  }
}

</mosaic_0001>

<bundles_post_ra>
// kernel: tpu_custom_call.1
= control target key start
LH: loop header
LB: loop body
LE: loop exit
PB: predicated region body
PF: predicated region fallthrough
CT: control target
= control target key end

     0   :  { %12 = vsyncpa [#allocation3], 0  ;;  %s1164_s0 = inlined_call_operand.hbm [shape: f32[8,16], index: 0, kind: input, shape index: {}]   ;;  %s1165_s1 = inlined_call_operand.hbm [shape: bf16[16,512], index: 1, kind: input, shape index: {}]   ;;  %s1166_s2 = inlined_call_operand.hbm [shape: f32[1,512], index: 2, kind: input, shape index: {}]   ;;  %s1167_s3 = inlined_call_operand.hbm [shape: bf16[512,128], index: 3, kind: input, shape index: {}]   ;;  %s1168_s4 = inlined_call_operand.vmem [shape: f32[1,128], index: 4, kind: input, shape index: {}]   ;;  %s1169_s5 = inlined_call_operand.hbm [shape: bf16[128,128], index: 5, kind: input, shape index: {}]   ;;  %s1170_s6 = inlined_call_operand.vmem [shape: f32[1,128], index: 6, kind: input, shape index: {}]   ;;  %s1171_s7 = inlined_call_operand.hbm [shape: bf16[8,128], index: 7, kind: output, shape index: {}]  }
   0x1   :  { %13 = vsyncpa [#allocation6], 0 }
   0x2   :  { %14 = vsyncpa [#allocation9], 0 }
   0x3   :  { %15 = vsyncpa [#allocation4], 0  ;;  %s1055_s24 = smov [#allocation5]  }
   0x4   :  { %s31_s25 = sshll.u32 %s1055_s24, 4  ;;  %s32_s25 = int_to_ptr.vmem [resolvable:$true] %s31_s25 }
   0x5   :  { %s935_s26 = scalar_lea.vmem %s32_s25, 512  ;;  %p940_p1 = scmp.lt.s32.totalorder %s32_s25, %s32_s25 }
   0x6   :  { %p936_p0 = scmp.ne.s32.totalorder %s32_s25, %s935_s26  ;;  %p941_p2 = scmp.lt.s32.totalorder %s935_s26, %s935_s26 }
   0x8   :  { %p942_p3 = por %p941_p2, %p940_p1 }
   0xa   :  { %p943_p4 = pnand %p942_p3, %p936_p0 }
   0xc   :  { %946 = shalt.err (!%p943_p4)
}
   0xd   :  { %s1056_s27 = smov 256   ;;  %s1057_s28 = smov 16  }
   0xe   :  { %37 = dma.hbm_to_vmem [thread:$0]  %s1165_s1, 512, %s32_s25, [#allocation6], %s1056_s27, %s1056_s27, %s1057_s28  }
   0xf   :  { %s1058_s8 = smov [#allocation8]  }
  0x10   :  { %s53_s9 = sshll.u32 %s1058_s8, 4  ;;  %s54_s9 = int_to_ptr.vmem [resolvable:$true] %s53_s9 }
  0x11   :  { %s955_s10 = scalar_lea.vmem %s54_s9, 4096  ;;  %p960_p6 = scmp.lt.s32.totalorder %s54_s9, %s54_s9 }
  0x12   :  { %p956_p5 = scmp.ne.s32.totalorder %s54_s9, %s955_s10  ;;  %p961_p7 = scmp.lt.s32.totalorder %s955_s10, %s955_s10 }
  0x14   :  { %p962_p8 = por %p961_p7, %p960_p6 }
  0x16   :  { %p963_p9 = pnand %p962_p8, %p956_p5 }
  0x18   :  { %966 = shalt.err (!%p963_p9)
}
  0x19   :  { %s1059_s11 = smov 64   ;;  %s1060_s12 = smov 4  }
  0x1a   :  { %59 = dma.hbm_to_vmem [thread:$0]  %s1167_s3, 4096, %s54_s9, [#allocation9], %s1059_s11, %s1059_s11, %s1060_s12  }
  0x1b   :  { %s1061_s1 = smov [#allocation2]   ;;  %s1062_s16 = smov [#allocation7]  }
  0x1c   :  { %s22_s15 = sshll.u32 %s1061_s1, 4  ;;  %s44_s17 = sshll.u32 %s1062_s16, 4  ;;  %s23_s15 = int_to_ptr.vmem [resolvable:$true] %s22_s15  ;;  %s45_s17 = int_to_ptr.vmem [resolvable:$true] %s44_s17 }
  0x1d   :  { %s975_s18 = scalar_lea.vmem %s23_s15, 128  ;;  %p980_p11 = scmp.lt.s32.totalorder %s23_s15, %s23_s15 }
  0x1e   :  { %p976_p10 = scmp.ne.s32.totalorder %s23_s15, %s975_s18  ;;  %p981_p12 = scmp.lt.s32.totalorder %s975_s18, %s975_s18 }
  0x20   :  { %p982_p13 = por %p981_p12, %p980_p11 }
  0x22   :  { %p983_p0 = pnand %p982_p13, %p976_p10 }
  0x24   :  { %986 = shalt.err (!%p983_p0)
}
  0x25   :  { %25 = dma.hbm_to_vmem [thread:$0]  %s1164_s0, 128, %s23_s15, [#allocation3]  }
  0x26   :  { %s995_s21 = scalar_lea.vmem %s45_s17, 64  ;;  %p1000_p2 = scmp.lt.s32.totalorder %s45_s17, %s45_s17 }
  0x27   :  { %p996_p1 = scmp.ne.s32.totalorder %s45_s17, %s995_s21  ;;  %p1001_p3 = scmp.lt.s32.totalorder %s995_s21, %s995_s21 }
  0x29   :  { %p1002_p4 = por %p1001_p3, %p1000_p2 }
  0x2b   :  { %p1003_p5 = pnand %p1002_p4, %p996_p1 }
  0x2d   :  { %1006 = shalt.err (!%p1003_p5)
}
  0x2e   :  { %47 = dma.hbm_to_vmem [thread:$0]  %s1166_s2, 64, %s45_s17, [#allocation6]  }
  0x2f   :  { %s1063_s23 = smov [#allocation10]  }
  0x30   :  { %s67_s24 = sshll.u32 %s1063_s23, 4  ;;  %s68_s24 = int_to_ptr.vmem [resolvable:$true] %s67_s24 }
  0x31   :  { %s1015_s25 = scalar_lea.vmem %s68_s24, 1024  ;;  %p1020_p7 = scmp.lt.s32.totalorder %s68_s24, %s68_s24 }
  0x32   :  { %p1016_p6 = scmp.ne.s32.totalorder %s68_s24, %s1015_s25  ;;  %p1021_p8 = scmp.lt.s32.totalorder %s1015_s25, %s1015_s25 }
  0x34   :  { %p1022_p9 = por %p1021_p8, %p1020_p7 }
  0x36   :  { %p1023_p10 = pnand %p1022_p9, %p1016_p6 }
  0x38   :  { %1026 = shalt.err (!%p1023_p10)
}
  0x39   :  { %73 = dma.hbm_to_vmem [thread:$0]  %s1169_s5, 1024, %s68_s24, [#allocation9], %s1059_s11, %s1059_s11, %s1060_s12  }
  0x3a   :  { %1047 = dma.done.wait [#allocation3], 128  }
  0x3b   :  { %1048 = vsyncadd [#allocation3], 4294967168 }
  0x3c   :  { %1049 = dma.done.wait [#allocation6], 576  }
  0x3d   :  { %1050 = vsyncadd [#allocation6], 4294966720 }
  0x3e   :  { %1051 = dma.done.wait [#allocation9], 5120  }
  0x3f   :  { %1052 = vsyncadd [#allocation9], 4294962176  ;;  %v1064_v0 = vmov 0   ;;  %v881_v1 = vld [vmem:[#allocation5 + $0x4] ss:$16 sps:$4 sm:$0xff]   ;;  %v92_v3 = vld [vmem:[#allocation2] sm:$0xff]  ;;  %v210_v40 = vlaneseq }
  0x40   :  { %154 = vmatprep.mubr.bf16.mxu1 %v1064_v0  ;;  %v883_v2 = vld [vmem:[#allocation5] ss:$16 sps:$4 sm:$0xff]   ;;  %136 = vmatprep.subr.bf16.mxu1 %v881_v1  ;;  %v93_v4 = vpack.c.bf16 %v92_v3, %v92_v3  ;;  %v884_v5 = vld [vmem:[#allocation5 + $0x8] ss:$16 sps:$4 sm:$0xff]   ;;  %v886_v6 = vld [vmem:[#allocation5 + $0xc] ss:$16 sps:$4 sm:$0xff]  }
  0x41   :  { %137 = vmatpush1.bf16.msra.mxu1 %v883_v2  ;;  %vm118_vm0 = vcmask 130048   ;;  %v887_v7 = vld [vmem:[#allocation8 + $0x78] sm:$0xff]   ;;  %v889_v9 = vld [vmem:[#allocation8 + $0x70] sm:$0xff]   ;;  %v891_v11 = vld [vmem:[#allocation8 + $0x68] sm:$0xff]   ;;  %v1065_v39 = vmov 0.0   ;;  %v211_v41 = vshrl.u32 %v210_v40, 7 }
  0x42   :  { %177 = vmatprep.subr.bf16.mxu1 %v886_v6  ;;  %v888_v8 = vld [vmem:[#allocation8 + $0x38] sm:$0xff]   ;;  %795 = vmatprep.subr.bf16.mxu0 %v887_v7  ;;  %v890_v10 = vld [vmem:[#allocation8 + $0x30] sm:$0xff]   ;;  %v893_v13 = vld [vmem:[#allocation8 + $0x28] sm:$0xff]   ;;  %vm1066_vm1 = vmmov 0   ;;  %s1067_s28 = smov [#allocation11]  }
  0x43   :  { %796 = vmatpush3.bf16.msra.mxu0 %v888_v8  ;;  %v892_v12 = vld [vmem:[#allocation8 + $0xf8] sm:$0xff]   ;;  %v895_v15 = vld [vmem:[#allocation8 + $0x60] sm:$0xff]   ;;  %v896_v16 = vld [vmem:[#allocation8 + $0xf0] sm:$0xff]   ;;  %v1134_v42 = vsub.s32 0, %v211_v41  ;;  %v216_v44 = vsub.s32 1, %v211_v41  ;;  %v220_v48 = vsub.s32 2, %v211_v41 }
  0x44   :  { %752 = vmatmul.mubr.msk.bf16.vlgmr.msra.gmra.mxu1 %vm118_vm0, %v93_v4  ;;  %797 = vmatprep.subr.bf16.mxu0 %v889_v9  ;;  %v894_v14 = vld [vmem:[#allocation8 + $0xb8] sm:$0xff]   ;;  %v897_v17 = vld [vmem:[#allocation8 + $0x20] sm:$0xff]   ;;  %v898_v18 = vld [vmem:[#allocation8 + $0xb0] sm:$0xff]   ;;  %v224_v50 = vsub.s32 3, %v211_v41  ;;  %s737_s29 = sshll.u32 %s1067_s28, 4  ;;  %s738_s29 = int_to_ptr.vmem [resolvable:$true] %s737_s29 }
  0x45   :  { %178 = vmatpush1.bf16.msra.mxu1 %v884_v5  ;;  %195 = vmatprep.mubr.bf16.mxu1 %v1064_v0  ;;  %v899_v19 = vld [vmem:[#allocation8 + $0x58] sm:$0xff]   ;;  %v900_v20 = vld [vmem:[#allocation8 + $0xe8] sm:$0xff]   ;;  %v903_v23 = vld [vmem:[#allocation8 + $0x50] sm:$0xff]   ;;  %s1027_s30 = scalar_lea.vmem %s738_s29, 64  ;;  %p1032_p12 = scmp.lt.s32.totalorder %s738_s29, %s738_s29 }
  0x46   :  { %817 = vmatprep.subr.bf16.mxu1 %v892_v12  ;;  %v901_v21 = vld [vmem:[#allocation8 + $0x18] sm:$0xff]   ;;  %v902_v22 = vld [vmem:[#allocation8 + $0xa8] sm:$0xff]   ;;  %v904_v24 = vld [vmem:[#allocation8 + $0xe0] sm:$0xff]   ;;  %p1028_p11 = scmp.ne.s32.totalorder %s738_s29, %s1027_s30  ;;  %p1033_p13 = scmp.lt.s32.totalorder %s1027_s30, %s1027_s30 }
  0x47   :  { %798 = vmatpush3.bf16.msra.mxu0 %v890_v10  ;;  %v905_v25 = vld [vmem:[#allocation8 + $0x10] sm:$0xff]   ;;  %v906_v26 = vld [vmem:[#allocation8 + $0xa0] sm:$0xff]   ;;  %v907_v27 = vld [vmem:[#allocation8 + $0x48] sm:$0xff]  }
  0x48   :  { %799 = vmatprep.subr.bf16.mxu0 %v891_v11  ;;  %v908_v28 = vld [vmem:[#allocation8 + $0xd8] sm:$0xff]   ;;  %v909_v29 = vld [vmem:[#allocation8 + $0x8] sm:$0xff]   ;;  %v911_v31 = vld [vmem:[#allocation8 + $0x40] sm:$0xff]   ;;  %p1034_p0 = por %p1033_p13, %p1032_p12 }
  0x49   :  { %v910_v30 = vld [vmem:[#allocation8 + $0x98] sm:$0xff]   ;;  %v912_v32 = vld [vmem:[#allocation8 + $0xd0] sm:$0xff]   ;;  %v913_v33 = vld [vmem:[#allocation8] sm:$0xff]  }
  0x4a   :  { %v914_v34 = vld [vmem:[#allocation8 + $0x90] sm:$0xff]   ;;  %v915_v35 = vld [vmem:[#allocation8 + $0xc8] sm:$0xff]   ;;  %v917_v37 = vld [vmem:[#allocation8 + $0xc0] sm:$0xff]   ;;  %p1035_p1 = pnand %p1034_p0, %p1028_p11 }
  0x4b   :  { %800 = vmatpush3.bf16.msra.mxu0 %v893_v13  ;;  %v916_v36 = vld [vmem:[#allocation8 + $0x88] sm:$0xff]   ;;  %v918_v38 = vld [vmem:[#allocation8 + $0x80] sm:$0xff]   ;;  %v208_v43 = vld [vmem:[#allocation7] sm:$0xf] }
  0x4c   :  { %753 = vmatmul.mubr.msk.bf16.vlgmr.msra.gmra.mxu1 %vm118_vm0, %v93_v4  ;;  %801 = vmatprep.subr.bf16.mxu0 %v895_v15  ;;  %v213_v45 = vrot.slane %v208_v43, %v1134_v42  ;;  %v217_v46 = vrot.slane %v208_v43, %v216_v44  ;;  %v221_v52 = vrot.slane %v208_v43, %v220_v48  ;;  %v919_v7 = vld [vmem:[#allocation10 + $0x38] sm:$0xff]   ;;  %v920_v15 = vld [vmem:[#allocation10 + $0x30] sm:$0xff]  }
  0x4d   :  { %818 = vmatpush3.bf16.msra.mxu1 %v894_v14  ;;  %v225_v54 = vrot.slane %v208_v43, %v224_v50 }
  0x4e   :  { %819 = vmatprep.subr.bf16.mxu1 %v896_v16  ;;  %v230_v47 = vpack.c.bf16 %v213_v45, %v213_v45  ;;  %v231_v49 = vpack.c.bf16 %v217_v46, %v217_v46  ;;  %v232_v57 = vpack.c.bf16 %v221_v52, %v221_v52 }
  0x4f   :  { %802 = vmatpush3.bf16.msra.mxu0 %v897_v17  ;;  %v233_v60 = vpack.c.bf16 %v225_v54, %v225_v54 }
  0x50   :  { %803 = vmatprep.subr.bf16.mxu0 %v899_v19  ;;  %v235_v51 = vpack.i.b16 %v230_v47, %v230_v47  ;;  %v242_v53 = vpack.i.b16 %v231_v49, %v231_v49  ;;  %v249_v2 = vpack.i.b16 %v232_v57, %v232_v57  ;;  %v786_v47 = vld [vmem:[%s1170_s6] ss:$0 sm:$0xff] }
  0x51   :  { %820 = vmatpush3.bf16.msra.mxu1 %v898_v18  ;;  %v256_v4 = vpack.i.b16 %v233_v60, %v233_v60 }
  0x52   :  { %821 = vmatprep.subr.bf16.mxu1 %v900_v20  ;;  %v240_v56 = vrot.slane %v235_v51, %v1134_v42  ;;  %v247_v59 = vrot.slane %v242_v53, %v1134_v42  ;;  %v254_v9 = vrot.slane %v249_v2, %v1134_v42 }
  0x53   :  { %804 = vmatpush3.bf16.msra.mxu0 %v901_v21  ;;  %v261_v12 = vrot.slane %v256_v4, %v1134_v42  ;;  %v921_v21 = vld [vmem:[#allocation10 + $0x28] sm:$0xff]  }
  0x54   :  { %805 = vmatprep.subr.bf16.mxu0 %v903_v23  ;;  %v922_v23 = vld [vmem:[#allocation10 + $0x20] sm:$0xff]  }
  0x55   :  { %822 = vmatpush3.bf16.msra.mxu1 %v902_v22 }
  0x56   :  { %823 = vmatprep.subr.bf16.mxu1 %v904_v24  ;;  %v923_v24 = vld [vmem:[#allocation10 + $0x18] sm:$0xff]  }
  0x57   :  { %806 = vmatpush3.bf16.msra.mxu0 %v905_v25  ;;  %v924_v25 = vld [vmem:[#allocation10 + $0x10] sm:$0xff]  }
  0x58   :  { %807 = vmatprep.subr.bf16.mxu0 %v907_v27  ;;  %v926_v27 = vld [vmem:[#allocation10] sm:$0xff]  }
  0x59   :  { %824 = vmatpush3.bf16.msra.mxu1 %v906_v26  ;;  %v925_v26 = vld [vmem:[#allocation10 + $0x8] sm:$0xff]  }
  0x5a   :  { %825 = vmatprep.subr.bf16.mxu1 %v908_v28 }
  0x5b   :  { %808 = vmatpush3.bf16.msra.mxu0 %v909_v29 }
  0x5c   :  { %809 = vmatprep.subr.bf16.mxu0 %v911_v31 }
  0x5d   :  { %826 = vmatpush3.bf16.msra.mxu1 %v910_v30  ;;  %v607_v30 = vld [vmem:[%s1168_s4] sm:$0x1] }
  0x5e   :  { %827 = vmatprep.subr.bf16.mxu1 %v912_v32  ;;  %v608_v32 = vpack.c.bf16 %v607_v30, %v607_v30 }
  0x5f   :  { %810 = vmatpush3.bf16.msra.mxu0 %v913_v33 }
  0x60   :  { %848 = vmatprep.subr.bf16.mxu0 %v1065_v39 }
  0x61   :  { %828 = vmatpush3.bf16.msra.mxu1 %v914_v34 }
  0x62   :  { %829 = vmatprep.subr.bf16.mxu1 %v915_v35  ;;  %v610_v35 = vpack.i.b16 %v608_v32, %v608_v32 }
  0x64   :  { %v615_v43 = vrot.slane %v610_v35, %v1134_v42 }
  0x65   :  { %830 = vmatpush3.bf16.msra.mxu1 %v916_v36 }
  0x66   :  { %831 = vmatprep.subr.bf16.mxu1 %v917_v37 }
  0x69   :  { %832 = vmatpush3.bf16.msra.mxu1 %v918_v38 }
 0x104   :  { %v156_v55 = vpop.f32.mrf.mxu1 }
 0x105   :  { %v204_v58 = vpack.c.bf16 %v156_v55, %v156_v55 }
 0x106   :  { %v158_v61 = vpop.f32.mrf.mxu1 }
 0x107   :  { %v205_v62 = vpack.c.bf16 %v158_v61, %v158_v61  ;;  %v262_v63 = vadd.bf16 %v240_v56, %v204_v58 }
 0x108   :  { %v160_v1 = vpop.f32.mrf.mxu1 }
 0x109   :  { %v263_v3 = vadd.bf16 %v247_v59, %v205_v62  ;;  %v266_v10 = vmax.bf16 %v1064_v0, %v262_v63 }
 0x10a   :  { %v161_v5 = vpop.f32.mrf.mxu1 }
 0x10b   :  { %v267_v6 = vmax.bf16 %v1064_v0, %v263_v3 }
 0x10c   :  { %v197_v8 = vpop.f32.mrf.mxu1 }
 0x10d   :  { %v206_v11 = vpack.c.bf16 %v197_v8, %v197_v8  ;;  %558 = vmatprep.mubr.bf16.mxu0 %v267_v6 }
 0x10e   :  { %v199_v13 = vpop.f32.mrf.mxu1  ;;  %559 = vmatmul.mubr.bf16.vlgmr.msra.gmra.mxu0 %v266_v10 }
 0x10f   :  { %v207_v14 = vpack.c.bf16 %v199_v13, %v199_v13  ;;  %849 = vmatpush3.bf16.msra.mxu0 %v919_v7  ;;  %v264_v16 = vadd.bf16 %v254_v9, %v206_v11  ;;  %864 = vmatprep.mubr.msk.bf16.mxu0 %vm1066_vm1, %v1065_v39 }
 0x110   :  { %v201_v17 = vpop.f32.mrf.mxu1  ;;  %850 = vmatprep.subr.bf16.mxu0 %v1065_v39 }
 0x111   :  { %v265_v18 = vadd.bf16 %v261_v12, %v207_v14  ;;  %v268_v22 = vmax.bf16 %v1064_v0, %v264_v16 }
 0x112   :  { %v202_v19 = vpop.f32.mrf.mxu1 }
 0x113   :  { %v269_v20 = vmax.bf16 %v1064_v0, %v265_v18  ;;  %851 = vmatpush3.bf16.msra.mxu0 %v920_v15 }
 0x114   :  { %852 = vmatprep.subr.bf16.mxu0 %v1065_v39 }
 0x115   :  { %598 = vmatprep.mubr.bf16.mxu1 %v269_v20 }
 0x116   :  { %599 = vmatmul.mubr.bf16.vlgmr.msra.gmra.mxu1 %v268_v22 }
 0x117   :  { %853 = vmatpush3.bf16.msra.mxu0 %v921_v21 }
 0x118   :  { %854 = vmatprep.subr.bf16.mxu0 %v1065_v39 }
 0x11b   :  { %855 = vmatpush3.bf16.msra.mxu0 %v922_v23 }
 0x11c   :  { %856 = vmatprep.subr.bf16.mxu0 %v1065_v39 }
 0x11f   :  { %857 = vmatpush3.bf16.msra.mxu0 %v923_v24 }
 0x120   :  { %858 = vmatprep.subr.bf16.mxu0 %v1065_v39 }
 0x123   :  { %859 = vmatpush3.bf16.msra.mxu0 %v924_v25 }
 0x124   :  { %860 = vmatprep.subr.bf16.mxu0 %v1065_v39 }
 0x127   :  { %861 = vmatpush3.bf16.msra.mxu0 %v925_v26 }
 0x128   :  { %862 = vmatprep.subr.bf16.mxu0 %v1065_v39 }
 0x12b   :  { %863 = vmatpush3.bf16.msra.mxu0 %v926_v27 }
 0x1ce   :  { %v811_v28 = vpop.f32.mrf.mxu0 }
 0x1d0   :  { %v812_v29 = vpop.f32.mrf.mxu0 }
 0x1d1   :  { %v813_v37 = vadd.f32 %v812_v29, %v811_v28 }
 0x1d2   :  { %v814_v31 = vpop.f32.mrf.mxu0 }
 0x1d4   :  { %v815_v33 = vpop.f32.mrf.mxu0 }
 0x1d6   :  { %v833_v34 = vpop.f32.mrf.mxu1 }
 0x1d8   :  { %v834_v36 = vpop.f32.mrf.mxu1 }
 0x1d9   :  { %v835_v38 = vadd.f32 %v834_v36, %v833_v34 }
 0x1da   :  { %v836_v40 = vpop.f32.mrf.mxu1 }
 0x1db   :  { %v601_v41 = vadd.f32 %v835_v38, %v813_v37 }
 0x1dc   :  { %v837_v44 = vpop.f32.mrf.mxu1 }
 0x1dd   :  { %v606_v39 = vpack.c.bf16 %v601_v41, %v601_v41 }
 0x1df   :  { %v616_v45 = vadd.bf16 %v615_v43, %v606_v39 }
 0x1e1   :  { %v617_v46 = vmax.bf16 %v1064_v0, %v616_v45 }
 0x1e3   :  { %865 = vmatmul.mubr.bf16.vlgmr.msra.gmra.mxu0 %v617_v46 }
 0x2a3   :  { %v723_v48 = vpop.f32.mrf.mxu0 }
 0x2a4   :  { %v724_v49 = vadd.f32 %v786_v47, %v723_v48 }
 0x2a5   :  { %v866_v50 = vpop.f32.mrf.mxu0 }
 0x2a6   :  { %v729_v51 = vpack.c.bf16 %v724_v49, %v724_v49 }
 0x2a7   :  { %v726_v52 = vpop.f32.mrf.mxu0 }
 0x2a8   :  { %730 = vst [vmem:[#allocation11] sm:$0xf] %v729_v51 }
 0x2a9   :  { %v867_v42 = vpop.f32.mrf.mxu0 }
 0x2aa   :  { %1038 = shalt.err (!%p1035_p1)
}
 0x2ab   :  { %740 = dma.vmem_to_hbm [thread:$0]  %s738_s29, 64, %s1171_s7, [#allocation4]  }
 0x2ac   :  { %1053 = dma.done.wait [#allocation4], 64  }
 0x2ad   :  { %1054 = vsyncadd [#allocation4], 4294967232 }
 0x2ae   :  { %744 = vsyncpa [#allocation3], 1 }
 0x2af   :  { %745 = vsyncpa [#allocation6], 1 }
 0x2b0   :  { %746 = vsyncpa [#allocation9], 1 }
 0x2b1   :  { %747 = vsyncpa [#allocation4], 1 }

</bundles_post_ra>
